<compile_context>
chip_gen: v7x
topology: tpu7x:2x2x1
jax: 0.10.0
libtpu: 0.0.40
codegen_flags: <defaults>
</compile_context>

<pallas_src>
import jax
import jax.numpy as jnp
from jax.experimental import pallas as pl
from jax.experimental.pallas import tpu as pltpu

NUM_STEPS = 2
THRESHOLD = 1.0
BETA = 1.0
LANE = 128
SUB = 8


def snn_kernel(params_ref, x_ref, spk_ref, mem_ref):
    # params (SMEM, f32[10]):
    #   [w1_00, w1_01, w1_10, w1_11, b1_0, b1_1, w2_00, w2_01, b2_0, beta]
    # (torch layout: w1 is (out, in), w2 is (out=1, in=2))
    w1_00 = params_ref[0]
    w1_01 = params_ref[1]
    w1_10 = params_ref[2]
    w1_11 = params_ref[3]
    b1_0 = params_ref[4]
    b1_1 = params_ref[5]
    w2_0 = params_ref[6]
    w2_1 = params_ref[7]
    b2_0 = params_ref[8]
    beta = params_ref[9]

    # Feature planes, each a dense (block_rows, 128) slab; lanes/rows = batch.
    x0 = x_ref[0]
    x1 = x_ref[1]

    # fc1(x) is identical at every step (x constant) -> compute once.
    cur1_0 = w1_00 * x0 + w1_01 * x1 + b1_0
    cur1_1 = w1_10 * x0 + w1_11 * x1 + b1_1

    # Hoisted scalar->vector broadcasts (JAX does not CSE broadcast_in_dim
    # inside the unrolled step loop).
    w2_0_b = jnp.full_like(x0, w2_0)
    w2_1_b = jnp.full_like(x0, w2_1)
    b2_0_b = jnp.full_like(x0, b2_0)

    zeros = jnp.zeros_like(x0)
    mem1_0 = zeros          # lif1.init_leaky()
    mem1_1 = zeros
    mem2 = zeros            # lif2.init_leaky()

    num_steps = spk_ref.shape[0]
    for step in range(num_steps):   # tiny, fixed trip count -> static unroll
        # lif1: subtract-reset on the incoming membrane, exact snntorch order:
        #   mem = (beta*mem + cur) - reset*threshold
        mem1_0 = (beta * mem1_0 + cur1_0) - jnp.where(mem1_0 > THRESHOLD, THRESHOLD, 0.0)
        mem1_1 = (beta * mem1_1 + cur1_1) - jnp.where(mem1_1 > THRESHOLD, THRESHOLD, 0.0)
        # fc2: spike (0/1) * weight fused into a select (no cast+mul round trip)
        cur2 = (jnp.where(mem1_0 > THRESHOLD, w2_0_b, 0.0)
                + jnp.where(mem1_1 > THRESHOLD, w2_1_b, 0.0)) + b2_0_b
        # lif2
        mem2 = (beta * mem2 + cur2) - jnp.where(mem2 > THRESHOLD, THRESHOLD, 0.0)
        spk2 = (mem2 > THRESHOLD).astype(jnp.float32)
        # One dense, unmasked whole-vreg store per output per step.
        spk_ref[step] = spk2
        mem_ref[step] = mem2


def _round_up(n, m):
    return ((n + m - 1) // m) * m


def net2_forward(x, w1, b1, w2, b2, num_steps=NUM_STEPS, beta=BETA):
    """x: (B, 2) f32. w1: (2, 2) torch-layout (out, in). b1: (2,). w2: (1, 2).
    b2: (1,). Returns (spk2_rec, mem2_rec), each (num_steps, B, 1)."""
    B = x.shape[0]

    # ---- dense (rows, 128) batch layout; rows a multiple of 8 so every block
    # ---- is whole (8,128) f32 tiles (unmasked vld/vst, no sublane padding).
    r_needed = _round_up(pl.cdiv(B, LANE), SUB)
    target_rows = 1024                     # 512 KiB per f32 plane per grid step
    if r_needed <= 2 * SUB:
        block_rows = r_needed              # tiny batch: single minimal block
    elif r_needed <= 2 * target_rows:
        # medium batch: 2 blocks so v7x megacore gets both TensorCores working
        block_rows = _round_up(pl.cdiv(r_needed, 2), SUB)
    else:
        block_rows = target_rows           # large batch: ~3 MiB moved per step
    rows = _round_up(r_needed, block_rows)
    b_pad = rows * LANE
    grid = (rows // block_rows,)

    # ---- single layout pass: batch-major (B,2) -> feature-major (2, rows, 128)
    x_f32 = x.astype(jnp.float32)
    if b_pad != B:
        x_f32 = jnp.pad(x_f32, ((0, b_pad - B), (0, 0)))
    x_fm = x_f32.T.reshape(2, rows, LANE)

    params = jnp.concatenate([
        w1.reshape(-1), b1.reshape(-1), w2.reshape(-1), b2.reshape(-1),
        jnp.asarray([beta], jnp.float32),
    ]).astype(jnp.float32)                                    # (10,) -> SMEM

    smem_spec = pl.BlockSpec(memory_space=pltpu.MemorySpace.SMEM)
    x_spec = pl.BlockSpec((2, block_rows, LANE), lambda i: (0, i, 0))
    o_spec = pl.BlockSpec((num_steps, block_rows, LANE), lambda i: (0, i, 0))
    out_shape = (
        jax.ShapeDtypeStruct((num_steps, rows, LANE), jnp.float32),
        jax.ShapeDtypeStruct((num_steps, rows, LANE), jnp.float32),
    )

    cost = pl.CostEstimate(
        flops=num_steps * b_pad * 14,
        transcendentals=0,
        bytes_accessed=4 * (2 * b_pad + 2 * num_steps * b_pad + params.size),
    )

    spk_out, mem_out = pl.pallas_call(
        snn_kernel,
        out_shape=out_shape,
        grid=grid,
        in_specs=[smem_spec, x_spec],
        out_specs=(o_spec, o_spec),
        compiler_params=pltpu.CompilerParams(
            dimension_semantics=("parallel",),
            vmem_limit_bytes=32 * 1024 * 1024,   # ~10 MiB actually used; safe on v5e/v6e/v7x
        ),
        cost_estimate=cost,
    )(params, x_fm)

    # Contiguous reshape + slice back to the original batch (padded lanes dropped).
    spk2_rec = spk_out.reshape(num_steps, b_pad)[:, :B, None]   # (num_steps, B, 1)
    mem2_rec = mem_out.reshape(num_steps, b_pad)[:, :B, None]
    return spk2_rec, mem2_rec


def net2_reference(x, w1, b1, w2, b2, num_steps=NUM_STEPS, beta=BETA):
    """Pure-JAX reference mirroring the PyTorch/snntorch forward (exact f32
    multiply-adds for the tiny Linear layers)."""
    B = x.shape[0]
    x = x.astype(jnp.float32)
    cur1 = x[:, 0:1] * w1[:, 0][None, :] + x[:, 1:2] * w1[:, 1][None, :] + b1[None, :]
    mem1 = jnp.zeros((B, 2), jnp.float32)
    mem2 = jnp.zeros((B, 1), jnp.float32)
    spk2_rec, mem2_rec = [], []
    for _ in range(num_steps):
        reset1 = (mem1 > THRESHOLD).astype(jnp.float32)
        mem1 = beta * mem1 + cur1 - reset1 * THRESHOLD
        spk1 = (mem1 > THRESHOLD).astype(jnp.float32)
        cur2 = spk1[:, 0:1] * w2[0, 0] + spk1[:, 1:2] * w2[0, 1] + b2[None, :]
        reset2 = (mem2 > THRESHOLD).astype(jnp.float32)
        mem2 = beta * mem2 + cur2 - reset2 * THRESHOLD
        spk2 = (mem2 > THRESHOLD).astype(jnp.float32)
        spk2_rec.append(spk2)
        mem2_rec.append(mem2)
    return jnp.stack(spk2_rec, 0), jnp.stack(mem2_rec, 0)


if __name__ == "__main__":
    key = jax.random.PRNGKey(0)
    kx, kw1, kb1, kw2, kb2 = jax.random.split(key, 5)

    B = 8
    x = jax.random.normal(kx, (B, 2), dtype=jnp.float32)

    # Deterministic parameter init matching the module's __init__ distributions.
    w1 = jax.random.uniform(kw1, (2, 2), minval=0.0, maxval=2.0, dtype=jnp.float32)
    b1 = jax.random.uniform(kb1, (2,), minval=-1.0 / jnp.sqrt(2.0),
                            maxval=1.0 / jnp.sqrt(2.0), dtype=jnp.float32)
    w2 = jax.random.uniform(kw2, (1, 2), minval=-1.0, maxval=3.0, dtype=jnp.float32)
    b2 = jax.random.uniform(kb2, (1,), minval=-1.0 / jnp.sqrt(2.0),
                            maxval=1.0 / jnp.sqrt(2.0), dtype=jnp.float32)

    spk2_rec, mem2_rec = net2_forward(x, w1, b1, w2, b2)
    jax.block_until_ready((spk2_rec, mem2_rec))

    ref_spk2, ref_mem2 = net2_reference(x, w1, b1, w2, b2)
    assert spk2_rec.shape == (NUM_STEPS, B, 1) and mem2_rec.shape == (NUM_STEPS, B, 1)
    assert jnp.allclose(spk2_rec, ref_spk2, atol=1e-6)
    assert jnp.allclose(mem2_rec, ref_mem2, atol=1e-5)

    print("KERNEL_OK")
</pallas_src>

<mosaic_0001>
module attributes {stable_mosaic.version = 11 : i64} {
  func.func @snn_kernel(%arg0: i32, %arg1: memref<10xf32, #tpu.memory_space<smem>>, %arg2: memref<2x8x128xf32, #tpu.memory_space<vmem>>, %arg3: memref<2x8x128xf32, #tpu.memory_space<vmem>>, %arg4: memref<2x8x128xf32, #tpu.memory_space<vmem>>) attributes {dimension_semantics = [#tpu.dimension_semantics<parallel>], iteration_bounds = array<i64: 1>, scalar_prefetch = 0 : i64, scratch_operands = 0 : i64, tpu.core_type = #tpu.core_type<tc>, window_params = [{transform_indices = @transform_0, window_bounds = array<i64: 10>}, {transform_indices = @transform_1, window_bounds = array<i64: 2, 8, 128>}, {transform_indices = @transform_2, window_bounds = array<i64: 2, 8, 128>}, {transform_indices = @transform_3, window_bounds = array<i64: 2, 8, 128>}]} {
    %c0 = arith.constant 0 : index
    %0 = memref.load %arg1[%c0] : memref<10xf32, #tpu.memory_space<smem>>
    %c1 = arith.constant 1 : index
    %1 = memref.load %arg1[%c1] : memref<10xf32, #tpu.memory_space<smem>>
    %c2 = arith.constant 2 : index
    %2 = memref.load %arg1[%c2] : memref<10xf32, #tpu.memory_space<smem>>
    %c3 = arith.constant 3 : index
    %3 = memref.load %arg1[%c3] : memref<10xf32, #tpu.memory_space<smem>>
    %c4 = arith.constant 4 : index
    %4 = memref.load %arg1[%c4] : memref<10xf32, #tpu.memory_space<smem>>
    %c5 = arith.constant 5 : index
    %5 = memref.load %arg1[%c5] : memref<10xf32, #tpu.memory_space<smem>>
    %c6 = arith.constant 6 : index
    %6 = memref.load %arg1[%c6] : memref<10xf32, #tpu.memory_space<smem>>
    %c7 = arith.constant 7 : index
    %7 = memref.load %arg1[%c7] : memref<10xf32, #tpu.memory_space<smem>>
    %c8 = arith.constant 8 : index
    %8 = memref.load %arg1[%c8] : memref<10xf32, #tpu.memory_space<smem>>
    %c9 = arith.constant 9 : index
    %9 = memref.load %arg1[%c9] : memref<10xf32, #tpu.memory_space<smem>>
    %c0_0 = arith.constant 0 : index
    %c0_1 = arith.constant 0 : index
    %c0_2 = arith.constant 0 : index
    %10 = vector.load %arg2[%c0_0, %c0_1, %c0_2] : memref<2x8x128xf32, #tpu.memory_space<vmem>>, vector<1x8x128xf32>
    %11 = vector.shape_cast %10 : vector<1x8x128xf32> to vector<8x128xf32>
    %c1_3 = arith.constant 1 : index
    %c0_4 = arith.constant 0 : index
    %c0_5 = arith.constant 0 : index
    %12 = vector.load %arg2[%c1_3, %c0_4, %c0_5] : memref<2x8x128xf32, #tpu.memory_space<vmem>>, vector<1x8x128xf32>
    %13 = vector.shape_cast %12 : vector<1x8x128xf32> to vector<8x128xf32>
    %14 = vector.broadcast %0 : f32 to vector<8x128xf32>
    %15 = arith.mulf %14, %11 : vector<8x128xf32>
    %16 = vector.broadcast %1 : f32 to vector<8x128xf32>
    %17 = arith.mulf %16, %13 : vector<8x128xf32>
    %18 = arith.addf %15, %17 : vector<8x128xf32>
    %19 = vector.broadcast %4 : f32 to vector<8x128xf32>
    %20 = arith.addf %18, %19 : vector<8x128xf32>
    %21 = vector.broadcast %2 : f32 to vector<8x128xf32>
    %22 = arith.mulf %21, %11 : vector<8x128xf32>
    %23 = vector.broadcast %3 : f32 to vector<8x128xf32>
    %24 = arith.mulf %23, %13 : vector<8x128xf32>
    %25 = arith.addf %22, %24 : vector<8x128xf32>
    %26 = vector.broadcast %5 : f32 to vector<8x128xf32>
    %27 = arith.addf %25, %26 : vector<8x128xf32>
    %28 = vector.broadcast %6 : f32 to vector<8x128xf32>
    %29 = vector.broadcast %7 : f32 to vector<8x128xf32>
    %30 = vector.broadcast %8 : f32 to vector<8x128xf32>
    %cst = arith.constant 0.000000e+00 : f32
    %31 = vector.broadcast %cst : f32 to vector<8x128xf32>
    %32 = vector.broadcast %9 : f32 to vector<8x128xf32>
    %33 = arith.mulf %32, %31 : vector<8x128xf32>
    %34 = arith.addf %33, %20 : vector<8x128xf32>
    %cst_6 = arith.constant 1.000000e+00 : f32
    %35 = vector.broadcast %cst_6 : f32 to vector<8x128xf32>
    %36 = arith.cmpf ogt, %31, %35 : vector<8x128xf32>
    %cst_7 = arith.constant 1.000000e+00 : f32
    %cst_8 = arith.constant 0.000000e+00 : f32
    %37 = vector.broadcast %cst_7 : f32 to vector<8x128xf32>
    %38 = vector.broadcast %cst_8 : f32 to vector<8x128xf32>
    %39 = arith.select %36, %37, %38 : vector<8x128xi1>, vector<8x128xf32>
    %40 = arith.subf %34, %39 : vector<8x128xf32>
    %41 = vector.broadcast %9 : f32 to vector<8x128xf32>
    %42 = arith.mulf %41, %31 : vector<8x128xf32>
    %43 = arith.addf %42, %27 : vector<8x128xf32>
    %cst_9 = arith.constant 1.000000e+00 : f32
    %44 = vector.broadcast %cst_9 : f32 to vector<8x128xf32>
    %45 = arith.cmpf ogt, %31, %44 : vector<8x128xf32>
    %cst_10 = arith.constant 1.000000e+00 : f32
    %cst_11 = arith.constant 0.000000e+00 : f32
    %46 = vector.broadcast %cst_10 : f32 to vector<8x128xf32>
    %47 = vector.broadcast %cst_11 : f32 to vector<8x128xf32>
    %48 = arith.select %45, %46, %47 : vector<8x128xi1>, vector<8x128xf32>
    %49 = arith.subf %43, %48 : vector<8x128xf32>
    %cst_12 = arith.constant 1.000000e+00 : f32
    %50 = vector.broadcast %cst_12 : f32 to vector<8x128xf32>
    %51 = arith.cmpf ogt, %40, %50 : vector<8x128xf32>
    %cst_13 = arith.constant 0.000000e+00 : f32
    %52 = vector.broadcast %cst_13 : f32 to vector<8x128xf32>
    %53 = arith.select %51, %28, %52 : vector<8x128xi1>, vector<8x128xf32>
    %cst_14 = arith.constant 1.000000e+00 : f32
    %54 = vector.broadcast %cst_14 : f32 to vector<8x128xf32>
    %55 = arith.cmpf ogt, %49, %54 : vector<8x128xf32>
    %cst_15 = arith.constant 0.000000e+00 : f32
    %56 = vector.broadcast %cst_15 : f32 to vector<8x128xf32>
    %57 = arith.select %55, %29, %56 : vector<8x128xi1>, vector<8x128xf32>
    %58 = arith.addf %53, %57 : vector<8x128xf32>
    %59 = arith.addf %58, %30 : vector<8x128xf32>
    %60 = vector.broadcast %9 : f32 to vector<8x128xf32>
    %61 = arith.mulf %60, %31 : vector<8x128xf32>
    %62 = arith.addf %61, %59 : vector<8x128xf32>
    %cst_16 = arith.constant 1.000000e+00 : f32
    %63 = vector.broadcast %cst_16 : f32 to vector<8x128xf32>
    %64 = arith.cmpf ogt, %31, %63 : vector<8x128xf32>
    %cst_17 = arith.constant 1.000000e+00 : f32
    %cst_18 = arith.constant 0.000000e+00 : f32
    %65 = vector.broadcast %cst_17 : f32 to vector<8x128xf32>
    %66 = vector.broadcast %cst_18 : f32 to vector<8x128xf32>
    %67 = arith.select %64, %65, %66 : vector<8x128xi1>, vector<8x128xf32>
    %68 = arith.subf %62, %67 : vector<8x128xf32>
    %cst_19 = arith.constant 1.000000e+00 : f32
    %69 = vector.broadcast %cst_19 : f32 to vector<8x128xf32>
    %70 = arith.cmpf ogt, %68, %69 : vector<8x128xf32>
    %71 = arith.extui %70 : vector<8x128xi1> to vector<8x128xi32>
    %72 = arith.sitofp %71 : vector<8x128xi32> to vector<8x128xf32>
    %c0_20 = arith.constant 0 : index
    %c0_21 = arith.constant 0 : index
    %c0_22 = arith.constant 0 : index
    %73 = vector.load %arg3[%c0_20, %c0_21, %c0_22] : memref<2x8x128xf32, #tpu.memory_space<vmem>>, vector<1x8x128xf32>
    %74 = vector.shape_cast %73 : vector<1x8x128xf32> to vector<8x128xf32>
    %75 = vector.shape_cast %72 : vector<8x128xf32> to vector<1x8x128xf32>
    tpu.vector_store %arg3[%c0_20, %c0_21, %c0_22], %75 {strides = array<i32>} : memref<2x8x128xf32, #tpu.memory_space<vmem>>, vector<1x8x128xf32>,
    %c0_23 = arith.constant 0 : index
    %c0_24 = arith.constant 0 : index
    %c0_25 = arith.constant 0 : index
    %76 = vector.load %arg4[%c0_23, %c0_24, %c0_25] : memref<2x8x128xf32, #tpu.memory_space<vmem>>, vector<1x8x128xf32>
    %77 = vector.shape_cast %76 : vector<1x8x128xf32> to vector<8x128xf32>
    %78 = vector.shape_cast %68 : vector<8x128xf32> to vector<1x8x128xf32>
    tpu.vector_store %arg4[%c0_23, %c0_24, %c0_25], %78 {strides = array<i32>} : memref<2x8x128xf32, #tpu.memory_space<vmem>>, vector<1x8x128xf32>,
    %79 = vector.broadcast %9 : f32 to vector<8x128xf32>
    %80 = arith.mulf %79, %40 : vector<8x128xf32>
    %81 = arith.addf %80, %20 : vector<8x128xf32>
    %cst_26 = arith.constant 1.000000e+00 : f32
    %82 = vector.broadcast %cst_26 : f32 to vector<8x128xf32>
    %83 = arith.cmpf ogt, %40, %82 : vector<8x128xf32>
    %cst_27 = arith.constant 1.000000e+00 : f32
    %cst_28 = arith.constant 0.000000e+00 : f32
    %84 = vector.broadcast %cst_27 : f32 to vector<8x128xf32>
    %85 = vector.broadcast %cst_28 : f32 to vector<8x128xf32>
    %86 = arith.select %83, %84, %85 : vector<8x128xi1>, vector<8x128xf32>
    %87 = arith.subf %81, %86 : vector<8x128xf32>
    %88 = vector.broadcast %9 : f32 to vector<8x128xf32>
    %89 = arith.mulf %88, %49 : vector<8x128xf32>
    %90 = arith.addf %89, %27 : vector<8x128xf32>
    %cst_29 = arith.constant 1.000000e+00 : f32
    %91 = vector.broadcast %cst_29 : f32 to vector<8x128xf32>
    %92 = arith.cmpf ogt, %49, %91 : vector<8x128xf32>
    %cst_30 = arith.constant 1.000000e+00 : f32
    %cst_31 = arith.constant 0.000000e+00 : f32
    %93 = vector.broadcast %cst_30 : f32 to vector<8x128xf32>
    %94 = vector.broadcast %cst_31 : f32 to vector<8x128xf32>
    %95 = arith.select %92, %93, %94 : vector<8x128xi1>, vector<8x128xf32>
    %96 = arith.subf %90, %95 : vector<8x128xf32>
    %cst_32 = arith.constant 1.000000e+00 : f32
    %97 = vector.broadcast %cst_32 : f32 to vector<8x128xf32>
    %98 = arith.cmpf ogt, %87, %97 : vector<8x128xf32>
    %cst_33 = arith.constant 0.000000e+00 : f32
    %99 = vector.broadcast %cst_33 : f32 to vector<8x128xf32>
    %100 = arith.select %98, %28, %99 : vector<8x128xi1>, vector<8x128xf32>
    %cst_34 = arith.constant 1.000000e+00 : f32
    %101 = vector.broadcast %cst_34 : f32 to vector<8x128xf32>
    %102 = arith.cmpf ogt, %96, %101 : vector<8x128xf32>
    %cst_35 = arith.constant 0.000000e+00 : f32
    %103 = vector.broadcast %cst_35 : f32 to vector<8x128xf32>
    %104 = arith.select %102, %29, %103 : vector<8x128xi1>, vector<8x128xf32>
    %105 = arith.addf %100, %104 : vector<8x128xf32>
    %106 = arith.addf %105, %30 : vector<8x128xf32>
    %107 = vector.broadcast %9 : f32 to vector<8x128xf32>
    %108 = arith.mulf %107, %68 : vector<8x128xf32>
    %109 = arith.addf %108, %106 : vector<8x128xf32>
    %cst_36 = arith.constant 1.000000e+00 : f32
    %110 = vector.broadcast %cst_36 : f32 to vector<8x128xf32>
    %111 = arith.cmpf ogt, %68, %110 : vector<8x128xf32>
    %cst_37 = arith.constant 1.000000e+00 : f32
    %cst_38 = arith.constant 0.000000e+00 : f32
    %112 = vector.broadcast %cst_37 : f32 to vector<8x128xf32>
    %113 = vector.broadcast %cst_38 : f32 to vector<8x128xf32>
    %114 = arith.select %111, %112, %113 : vector<8x128xi1>, vector<8x128xf32>
    %115 = arith.subf %109, %114 : vector<8x128xf32>
    %cst_39 = arith.constant 1.000000e+00 : f32
    %116 = vector.broadcast %cst_39 : f32 to vector<8x128xf32>
    %117 = arith.cmpf ogt, %115, %116 : vector<8x128xf32>
    %118 = arith.extui %117 : vector<8x128xi1> to vector<8x128xi32>
    %119 = arith.sitofp %118 : vector<8x128xi32> to vector<8x128xf32>
    %c1_40 = arith.constant 1 : index
    %c0_41 = arith.constant 0 : index
    %c0_42 = arith.constant 0 : index
    %120 = vector.load %arg3[%c1_40, %c0_41, %c0_42] : memref<2x8x128xf32, #tpu.memory_space<vmem>>, vector<1x8x128xf32>
    %121 = vector.shape_cast %120 : vector<1x8x128xf32> to vector<8x128xf32>
    %122 = vector.shape_cast %119 : vector<8x128xf32> to vector<1x8x128xf32>
    tpu.vector_store %arg3[%c1_40, %c0_41, %c0_42], %122 {strides = array<i32>} : memref<2x8x128xf32, #tpu.memory_space<vmem>>, vector<1x8x128xf32>,
    %c1_43 = arith.constant 1 : index
    %c0_44 = arith.constant 0 : index
    %c0_45 = arith.constant 0 : index
    %123 = vector.load %arg4[%c1_43, %c0_44, %c0_45] : memref<2x8x128xf32, #tpu.memory_space<vmem>>, vector<1x8x128xf32>
    %124 = vector.shape_cast %123 : vector<1x8x128xf32> to vector<8x128xf32>
    %125 = vector.shape_cast %115 : vector<8x128xf32> to vector<1x8x128xf32>
    tpu.vector_store %arg4[%c1_43, %c0_44, %c0_45], %125 {strides = array<i32>} : memref<2x8x128xf32, #tpu.memory_space<vmem>>, vector<1x8x128xf32>,
    return
  }
  func.func @transform_0(%arg0: i32) -> i32 {
    %c0_i32 = arith.constant 0 : i32
    %c0_i32_0 = arith.constant 0 : i32
    return %c0_i32 : i32
  }
  func.func @transform_1(%arg0: i32) -> (i32, i32, i32) {
    %c0_i32 = arith.constant 0 : i32
    %c0_i32_0 = arith.constant 0 : i32
    %c0_i32_1 = arith.constant 0 : i32
    return %c0_i32, %arg0, %c0_i32_0 : i32, i32, i32
  }
  func.func @transform_2(%arg0: i32) -> (i32, i32, i32) {
    %c0_i32 = arith.constant 0 : i32
    %c0_i32_0 = arith.constant 0 : i32
    %c0_i32_1 = arith.constant 0 : i32
    return %c0_i32, %arg0, %c0_i32_0 : i32, i32, i32
  }
  func.func @transform_3(%arg0: i32) -> (i32, i32, i32) {
    %c0_i32 = arith.constant 0 : i32
    %c0_i32_0 = arith.constant 0 : i32
    %c0_i32_1 = arith.constant 0 : i32
    return %c0_i32, %arg0, %c0_i32_0 : i32, i32, i32
  }
}

</mosaic_0001>

<bundles_post_ra>
// kernel: tpu_custom_call.1
= control target key start
LH: loop header
LB: loop body
LE: loop exit
PB: predicated region body
PF: predicated region fallthrough
CT: control target
= control target key end

     0   :  { %9 = vsyncpa [#allocation5], 0  ;;  %s352_s0 = inlined_call_operand.hbm [shape: f32[10], index: 0, kind: input, shape index: {}]   ;;  %s353_s1 = inlined_call_operand.hbm [shape: f32[2,8,128], index: 1, kind: input, shape index: {}]   ;;  %s354_s2 = inlined_call_operand.hbm [shape: f32[2,8,128], index: 2, kind: output, shape index: {0}]   ;;  %s355_s3 = inlined_call_operand.hbm [shape: f32[2,8,128], index: 3, kind: output, shape index: {1}]  }
   0x1   :  { %10 = vsyncpa [#allocation3], 0 }
   0x2   :  { %11 = vsyncpa [#allocation4], 0 }
   0x3   :  { %12 = vsyncpa [#allocation9], 0  ;;  %s168_s14 = scalar_lea.hbm %s352_s0, 16 }
   0x4   :  { %p169_p0 = scmp.ne.s32.totalorder %s352_s0, %s168_s14  ;;  %p172_p1 = scmp.lt.u32.totalorder %s168_s14, %s352_s0 }
   0x6   :  { %p174_p2 = pnand %p172_p1, %p169_p0 }
   0x8   :  { %177 = shalt.err (!%p174_p2)
}
   0x9   :  { %s252_s19 = smov [#allocation2]   ;;  %s253_s22 = smov [#allocation6]  }
   0xa   :  { %20 = dma.hbm_to_smem %s352_s0, 16, %s252_s19, [#allocation5]  }
   0xb   :  { %s26_s23 = sshll.u32 %s253_s22, 4  ;;  %s178_s26 = scalar_lea.hbm %s353_s1, 256  ;;  %s27_s23 = int_to_ptr.vmem [resolvable:$true] %s26_s23 }
   0xc   :  { %p179_p3 = scmp.ne.s32.totalorder %s353_s1, %s178_s26  ;;  %p182_p4 = scmp.lt.u32.totalorder %s178_s26, %s353_s1 }
   0xe   :  { %p184_p5 = pnand %p182_p4, %p179_p3 }
  0x10   :  { %187 = shalt.err (!%p184_p5)
}
  0x11   :  { %s188_s4 = scalar_lea.vmem %s27_s23, 256  ;;  %p193_p7 = scmp.lt.s32.totalorder %s27_s23, %s27_s23 }
  0x12   :  { %p189_p6 = scmp.ne.s32.totalorder %s27_s23, %s188_s4  ;;  %p194_p8 = scmp.lt.s32.totalorder %s188_s4, %s188_s4 }
  0x14   :  { %p195_p9 = por %p194_p8, %p193_p7 }
  0x16   :  { %p196_p10 = pnand %p195_p9, %p189_p6 }
  0x18   :  { %199 = shalt.err (!%p196_p10)
}
  0x19   :  { %s254_s0 = smov 128   ;;  %s255_s5 = smov 8  }
  0x1a   :  { %32 = dma.hbm_to_vmem [thread:$0]  %s353_s1, 256, %s27_s23, [#allocation3], %s254_s0, %s254_s0, %s255_s5  }
  0x1b   :  { %244 = dma.done.wait [#allocation5], 16  }
  0x1c   :  { %245 = vsyncadd [#allocation5], 4294967280 }
  0x1d   :  { %246 = dma.done.wait [#allocation3], 256  }
  0x1e   :  { %247 = vsyncadd [#allocation3], 4294967040 }
  0x1f   :  { %39 = sfence }
  0x20   :  { %s40_s8 = sld [smem:[#allocation2]]  ;;  %s150_s9 = sld [smem:[#allocation2 + $0x1]]  ;;  %v50_v0 = vld [vmem:[#allocation6] sm:$0xff]  ;;  %v52_v1 = vld [vmem:[#allocation6 + $0x8] sm:$0xff]  ;;  %v256_v24 = vmov 0.0  }
  0x21   :  { %s151_s10 = sld [smem:[#allocation2 + $0x2]]  ;;  %s152_s11 = sld [smem:[#allocation2 + $0x3]] }
  0x22   :  { %s153_s12 = sld [smem:[#allocation2 + $0x4]]  ;;  %s154_s13 = sld [smem:[#allocation2 + $0x5]] }
  0x23   :  { %s158_s14 = sld [smem:[#allocation2 + $0x9]]  ;;  %s306_s15 = sld [smem:[#allocation2 + $0x6]] }
  0x24   :  { %s308_s16 = sld [smem:[#allocation2 + $0x7]]  ;;  %s310_s1 = sld [smem:[#allocation2 + $0x8]] }
  0x25   :  { %s257_s17 = smov [#allocation8]   ;;  %s258_s19 = smov [#allocation7]  }
  0x26   :  { %v53_v2 = vstv %s40_s8  ;;  %v55_v3 = vstv %s150_s9  ;;  %s133_s18 = sshll.u32 %s257_s17, 4  ;;  %s121_s20 = sshll.u32 %s258_s19, 4  ;;  %s134_s18 = int_to_ptr.vmem [resolvable:$true] %s133_s18  ;;  %s315_s20 = int_to_ptr.vmem [resolvable:$true] %s121_s20 }
  0x27   :  { %v54_v4 = vmul.f32 %v53_v2, %v50_v0  ;;  %v56_v5 = vmul.f32 %v55_v3, %v52_v1  ;;  %v60_v6 = vstv %s151_s10  ;;  %v62_v7 = vstv %s152_s11  ;;  %s200_s21 = scalar_lea.vmem %s134_s18, 256  ;;  %p205_p12 = scmp.lt.s32.totalorder %s134_s18, %s134_s18 }
  0x28   :  { %v58_v8 = vstv %s153_s12  ;;  %v61_v9 = vmul.f32 %v60_v6, %v50_v0  ;;  %v63_v10 = vmul.f32 %v62_v7, %v52_v1  ;;  %v65_v12 = vstv %s154_s13  ;;  %p201_p11 = scmp.ne.s32.totalorder %s134_s18, %s200_s21  ;;  %p206_p13 = scmp.lt.s32.totalorder %s200_s21, %s200_s21 }
  0x29   :  { %v57_v11 = vadd.f32 %v56_v5, %v54_v4  ;;  %v70_v14 = vstv %s158_s14  ;;  %v67_v18 = vstv %s306_s15 }
  0x2a   :  { %v64_v13 = vadd.f32 %v63_v10, %v61_v9  ;;  %v71_v16 = vmul.f32 0.0, %v70_v14  ;;  %v68_v20 = vstv %s308_s16  ;;  %v69_v27 = vstv %s310_s1  ;;  %p207_p0 = por %p206_p13, %p205_p12 }
  0x2b   :  { %v59_v15 = vadd.f32 %v58_v8, %v57_v11 }
  0x2c   :  { %v66_v17 = vadd.f32 %v65_v12, %v64_v13  ;;  %p208_p1 = pnand %p207_p0, %p201_p11 }
  0x2d   :  { %v72_v19 = vadd.f32 %v71_v16, %v59_v15 }
  0x2e   :  { %v76_v21 = vadd.f32 %v71_v16, %v66_v17 }
  0x2f   :  { %vm78_vm0 = vcmp.gt.f32.partialorder %v72_v19, 1.0  ;;  %v91_v22 = vmul.f32 %v72_v19, %v70_v14 }
  0x30   :  { %v79_v23 = vsel %vm78_vm0, %v67_v18, 0.0  ;;  %vm80_vm1 = vcmp.gt.f32.partialorder %v76_v21, 1.0  ;;  %v93_v25 = vsel %vm78_vm0, 1.0, %v256_v24  ;;  %v95_v26 = vmul.f32 %v76_v21, %v70_v14 }
  0x31   :  { %v81_v28 = vsel %vm80_vm1, %v68_v20, 0.0  ;;  %v92_v29 = vadd.f32 %v91_v22, %v59_v15  ;;  %v97_v30 = vsel %vm80_vm1, 1.0, %v256_v24 }
  0x32   :  { %v82_v31 = vadd.f32 %v81_v28, %v79_v23  ;;  %v96_v32 = vadd.f32 %v95_v26, %v66_v17 }
  0x33   :  { %v94_v33 = vsub.f32 %v92_v29, %v93_v25 }
  0x34   :  { %v83_v34 = vadd.f32 %v82_v31, %v69_v27  ;;  %v98_v35 = vsub.f32 %v96_v32, %v97_v30 }
  0x35   :  { %vm99_vm2 = vcmp.gt.f32.partialorder %v94_v33, 1.0 }
  0x36   :  { %v84_v36 = vadd.f32 %v83_v34, %v71_v16  ;;  %v100_v37 = vsel %vm99_vm2, %v67_v18, 0.0  ;;  %vm101_vm3 = vcmp.gt.f32.partialorder %v98_v35, 1.0 }
  0x37   :  { %v102_v38 = vsel %vm101_vm3, %v68_v20, 0.0 }
  0x38   :  { %vm86_vm4 = vcmp.gt.f32.partialorder %v84_v36, 1.0  ;;  %v103_v39 = vadd.f32 %v102_v38, %v100_v37  ;;  %v105_v40 = vmul.f32 %v84_v36, %v70_v14  ;;  %90 = vst [vmem:[#allocation8] sm:$0xff] %v84_v36 }
  0x39   :  { %v159_v41 = vsel %vm86_vm4, 1.0, %v256_v24 }
  0x3a   :  { %89 = vst [vmem:[#allocation7] sm:$0xff] %v159_v41  ;;  %v104_v42 = vadd.f32 %v103_v39, %v69_v27 }
  0x3c   :  { %v106_v43 = vadd.f32 %v105_v40, %v104_v42 }
  0x3e   :  { %v108_v44 = vsub.f32 %v106_v43, %v159_v41 }
  0x40   :  { %115 = vst [vmem:[#allocation8 + $0x8] sm:$0xff] %v108_v44  ;;  %vm109_vm5 = vcmp.gt.f32.partialorder %v108_v44, 1.0 }
  0x41   :  { %v160_v45 = vsel %vm109_vm5, 1.0, %v256_v24 }
  0x42   :  { %211 = shalt.err (!%p208_p1)
}
  0x43   :  { %s212_s24 = scalar_lea.hbm %s355_s3, 256 }
  0x44   :  { %p213_p2 = scmp.ne.s32.totalorder %s355_s3, %s212_s24  ;;  %p216_p3 = scmp.lt.u32.totalorder %s212_s24, %s355_s3 }
  0x46   :  { %p218_p4 = pnand %p216_p3, %p213_p2 }
  0x48   :  { %221 = shalt.err (!%p218_p4)
}
  0x49   :  { %139 = dma.vmem_to_hbm [thread:$0]  %s134_s18, 256, %s355_s3, [#allocation9], %s254_s0, %s254_s0, %s255_s5   ;;  %113 = vst [vmem:[#allocation7 + $0x8] sm:$0xff] %v160_v45 }
  0x4a   :  { %s222_s4 = scalar_lea.vmem %s315_s20, 256  ;;  %p227_p6 = scmp.lt.s32.totalorder %s315_s20, %s315_s20 }
  0x4b   :  { %p223_p5 = scmp.ne.s32.totalorder %s315_s20, %s222_s4  ;;  %p228_p7 = scmp.lt.s32.totalorder %s222_s4, %s222_s4 }
  0x4d   :  { %p229_p8 = por %p228_p7, %p227_p6 }
  0x4f   :  { %p230_p9 = pnand %p229_p8, %p223_p5 }
  0x51   :  { %233 = shalt.err (!%p230_p9)
}
  0x52   :  { %s234_s8 = scalar_lea.hbm %s354_s2, 256 }
  0x53   :  { %p235_p10 = scmp.ne.s32.totalorder %s354_s2, %s234_s8  ;;  %p238_p11 = scmp.lt.u32.totalorder %s234_s8, %s354_s2 }
  0x55   :  { %p240_p12 = pnand %p238_p11, %p235_p10 }
  0x57   :  { %243 = shalt.err (!%p240_p12)
}
  0x58   :  { %127 = dma.vmem_to_hbm [thread:$0]  %s315_s20, 256, %s354_s2, [#allocation4], %s254_s0, %s254_s0, %s255_s5  }
  0x59   :  { %248 = dma.done.wait [#allocation4], 256  }
  0x5a   :  { %249 = vsyncadd [#allocation4], 4294967040 }
  0x5b   :  { %250 = dma.done.wait [#allocation9], 256  }
  0x5c   :  { %251 = vsyncadd [#allocation9], 4294967040 }
  0x5d   :  { %146 = vsyncpa [#allocation3], 1 }
  0x5e   :  { %147 = vsyncpa [#allocation4], 1 }
  0x5f   :  { %148 = vsyncpa [#allocation9], 1 }
  0x60   :  { %149 = vsyncpa [#allocation5], 1 }

</bundles_post_ra>
